<compile_context>
chip_gen: v6e
topology: v6e:2x2x1
jax: 0.10.0
libtpu: 0.0.40
codegen_flags: <defaults>
</compile_context>

<pallas_src>
import functools

import jax
import jax.numpy as jnp
from jax.experimental import pallas as pl
from jax.experimental.pallas import tpu as pltpu


# --------------------------------------------------------------------------- GRU cell
def _gru_cell(x_t, h_prev, wih, whh, bih, bhh, H):
    """One PyTorch-convention GRU step.
    x_t (B,E), h_prev (B,H), wih (E,3H), whh (H,3H), bih/bhh (1,3H). Gate order r,z,n."""
    gx = jnp.dot(x_t, wih, preferred_element_type=jnp.float32) + bih
    gh = jnp.dot(h_prev, whh, preferred_element_type=jnp.float32) + bhh
    r = 1.0 / (1.0 + jnp.exp(-(gx[:, 0 * H:1 * H] + gh[:, 0 * H:1 * H])))
    z = 1.0 / (1.0 + jnp.exp(-(gx[:, 1 * H:2 * H] + gh[:, 1 * H:2 * H])))
    n = jnp.tanh(gx[:, 2 * H:3 * H] + r * gh[:, 2 * H:3 * H])
    return (1.0 - z) * n + z * h_prev


# ------------------------------------------------- kernel 1: one GRU direction (plain)
def _gru_dir_kernel(x_ref, wih_ref, whh_ref, bih_ref, bhh_ref, o_ref, h_scr,
                    *, hidden_dim):
    """grid=(T,). x block (1,B,E), out block (1,B,H); weights resident (constant index)."""
    H = hidden_dim
    t = pl.program_id(0)

    @pl.when(t == 0)
    def _():
        h_scr[...] = jnp.zeros_like(h_scr)

    h_new = _gru_cell(x_ref[0], h_scr[...], wih_ref[...], whh_ref[...],
                      bih_ref[...], bhh_ref[...], H)
    h_scr[...] = h_new
    o_ref[0] = h_new.astype(o_ref.dtype)


# --------------------------- kernel 2: forward GRU fused with online-softmax attention
def _gru_attn_kernel(*refs, hidden_dim, bidirectional):
    H = hidden_dim
    if bidirectional:
        (x_ref, hb_ref, wih_ref, whh_ref, bih_ref, bhh_ref,
         watt_ref, batt_ref, o_ref, h_scr, m_scr, l_scr, acc_scr) = refs
    else:
        (x_ref, wih_ref, whh_ref, bih_ref, bhh_ref,
         watt_ref, batt_ref, o_ref, h_scr, m_scr, l_scr, acc_scr) = refs

    t = pl.program_id(0)
    T = pl.num_programs(0)

    @pl.when(t == 0)
    def _():
        h_scr[...] = jnp.zeros_like(h_scr)
        m_scr[...] = jnp.full_like(m_scr, -jnp.inf)
        l_scr[...] = jnp.zeros_like(l_scr)
        acc_scr[...] = jnp.zeros_like(acc_scr)

    # Forward GRU step.
    h_new = _gru_cell(x_ref[0], h_scr[...], wih_ref[...], whh_ref[...],
                      bih_ref[...], bhh_ref[...], H)
    h_scr[...] = h_new

    # Feature at time t = [h_fwd_t, h_bwd_t] (or just h_fwd_t if unidirectional).
    if bidirectional:
        feat = jnp.concatenate([h_new, hb_ref[0]], axis=-1)      # (B, 2H)
    else:
        feat = h_new                                             # (B, H)

    # Attention score for this timestep, then an online-softmax weighted accumulation:
    # result[b, j] = sum_t softmax_t(score[b, :, j]) * feat[b, t, j]
    s = jnp.dot(feat, watt_ref[...], preferred_element_type=jnp.float32) + batt_ref[...]
    m_prev = m_scr[...]
    m_new = jnp.maximum(m_prev, s)
    alpha = jnp.exp(m_prev - m_new)
    p = jnp.exp(s - m_new)
    l_scr[...] = alpha * l_scr[...] + p
    acc_scr[...] = alpha * acc_scr[...] + p * feat
    m_scr[...] = m_new

    @pl.when(t == T - 1)
    def _():
        o_ref[...] = (acc_scr[...] / l_scr[...]).astype(o_ref.dtype)


# ----------------------------------------------------------------------------- wrapper
def attention_gru(x, params, *, hidden_dim, bidirectional):
    """x: (B, T, input_dim) float32 (batch_first, like PyTorch). Returns (B, D*hidden)."""
    B, T, E = x.shape
    H = hidden_dim
    DH = 2 * H if bidirectional else H

    # Time-major activations: recurrence wants time on the leading (untiled) axis.
    xt = jnp.transpose(x, (1, 0, 2)).astype(jnp.float32)          # (T, B, E)

    # Parameter plumbing (tiny, once per call): transpose so kernels do row-major dots.
    wih_f = jnp.transpose(params["weight_ih_l0"])                 # (E, 3H)
    whh_f = jnp.transpose(params["weight_hh_l0"])                 # (H, 3H)
    bih_f = params["bias_ih_l0"].reshape(1, 3 * H)
    bhh_f = params["bias_hh_l0"].reshape(1, 3 * H)
    watt = jnp.transpose(params["att_weight"])                    # (DH, DH)
    batt = params["att_bias"].reshape(1, DH)

    def _resident(shape):                                         # loaded once, stays in VMEM
        return pl.BlockSpec(shape, lambda t: (0, 0))

    cparams = pltpu.CompilerParams(dimension_semantics=("arbitrary",))

    hb = None
    if bidirectional:
        wih_b = jnp.transpose(params["weight_ih_l0_reverse"])
        whh_b = jnp.transpose(params["weight_hh_l0_reverse"])
        bih_b = params["bias_ih_l0_reverse"].reshape(1, 3 * H)
        bhh_b = params["bias_hh_l0_reverse"].reshape(1, 3 * H)

        # Backward direction: grid step i processes time index T-1-i and writes its
        # output at the same original time index -> hb[t] = backward hidden at time t.
        rev = lambda i: (T - 1 - i, 0, 0)
        hb = pl.pallas_call(
            functools.partial(_gru_dir_kernel, hidden_dim=H),
            out_shape=jax.ShapeDtypeStruct((T, B, H), jnp.float32),
            grid=(T,),
            in_specs=[
                pl.BlockSpec((1, B, E), rev),
                _resident((E, 3 * H)),
                _resident((H, 3 * H)),
                _resident((1, 3 * H)),
                _resident((1, 3 * H)),
            ],
            out_specs=pl.BlockSpec((1, B, H), rev),
            scratch_shapes=[pltpu.VMEM((B, H), jnp.float32)],
            compiler_params=cparams,
        )(xt, wih_b, whh_b, bih_b, bhh_b)

    fwd = lambda i: (i, 0, 0)
    in_specs = [pl.BlockSpec((1, B, E), fwd)]
    args = [xt]
    if bidirectional:
        in_specs.append(pl.BlockSpec((1, B, H), fwd))
        args.append(hb)
    in_specs += [
        _resident((E, 3 * H)),
        _resident((H, 3 * H)),
        _resident((1, 3 * H)),
        _resident((1, 3 * H)),
        _resident((DH, DH)),
        _resident((1, DH)),
    ]
    args += [wih_f, whh_f, bih_f, bhh_f, watt, batt]

    out = pl.pallas_call(
        functools.partial(_gru_attn_kernel, hidden_dim=H, bidirectional=bidirectional),
        out_shape=jax.ShapeDtypeStruct((B, DH), jnp.float32),
        grid=(T,),
        in_specs=in_specs,
        out_specs=pl.BlockSpec((B, DH), lambda t: (0, 0)),        # resident accumulator
        scratch_shapes=[
            pltpu.VMEM((B, H), jnp.float32),    # forward hidden state
            pltpu.VMEM((B, DH), jnp.float32),   # online-softmax running max
            pltpu.VMEM((B, DH), jnp.float32),   # online-softmax running denominator
            pltpu.VMEM((B, DH), jnp.float32),   # online-softmax running numerator
        ],
        compiler_params=cparams,
    )(*args)
    return out


# --------------------------------------------------------------------- plain-JAX check
def _reference(x, params, *, hidden_dim, bidirectional):
    B, T, E = x.shape
    H = hidden_dim

    def run_dir(wih, whh, bih, bhh, reverse):
        def step(h, x_t):
            gx = x_t @ wih.T + bih
            gh = h @ whh.T + bhh
            r = jax.nn.sigmoid(gx[:, :H] + gh[:, :H])
            z = jax.nn.sigmoid(gx[:, H:2 * H] + gh[:, H:2 * H])
            n = jnp.tanh(gx[:, 2 * H:] + r * gh[:, 2 * H:])
            h_new = (1.0 - z) * n + z * h
            return h_new, h_new

        xs = jnp.transpose(x, (1, 0, 2))
        if reverse:
            xs = xs[::-1]
        _, hs = jax.lax.scan(step, jnp.zeros((B, H), jnp.float32), xs)
        if reverse:
            hs = hs[::-1]
        return jnp.transpose(hs, (1, 0, 2))                       # (B, T, H)

    out = run_dir(params["weight_ih_l0"], params["weight_hh_l0"],
                  params["bias_ih_l0"], params["bias_hh_l0"], reverse=False)
    if bidirectional:
        out_b = run_dir(params["weight_ih_l0_reverse"], params["weight_hh_l0_reverse"],
                        params["bias_ih_l0_reverse"], params["bias_hh_l0_reverse"],
                        reverse=True)
        out = jnp.concatenate([out, out_b], axis=-1)
    scores = out @ params["att_weight"].T + params["att_bias"]
    w = jax.nn.softmax(scores, axis=1)                            # softmax over time
    return jnp.sum(w * out, axis=1)


def _make_params(key, input_dim, hidden_dim, bidirectional):
    DH = (2 if bidirectional else 1) * hidden_dim
    names_shapes = [
        ("weight_ih_l0", (3 * hidden_dim, input_dim)),
        ("weight_hh_l0", (3 * hidden_dim, hidden_dim)),
        ("bias_ih_l0", (3 * hidden_dim,)),
        ("bias_hh_l0", (3 * hidden_dim,)),
    ]
    if bidirectional:
        names_shapes += [
            ("weight_ih_l0_reverse", (3 * hidden_dim, input_dim)),
            ("weight_hh_l0_reverse", (3 * hidden_dim, hidden_dim)),
            ("bias_ih_l0_reverse", (3 * hidden_dim,)),
            ("bias_hh_l0_reverse", (3 * hidden_dim,)),
        ]
    names_shapes += [("att_weight", (DH, DH)), ("att_bias", (DH,))]
    keys = jax.random.split(key, len(names_shapes))
    return {name: jax.random.normal(k, shape, dtype=jnp.float32) * 0.3
            for (name, shape), k in zip(names_shapes, keys)}


if __name__ == "__main__":
    B, T, input_dim, hidden_dim = 2, 8, 16, 32

    key = jax.random.PRNGKey(0)
    kx, kp1, kp2 = jax.random.split(key, 3)
    x = jax.random.normal(kx, (B, T, input_dim), dtype=jnp.float32)

    for bidirectional, kp in ((True, kp1), (False, kp2)):
        params = _make_params(kp, input_dim, hidden_dim, bidirectional)
        y = attention_gru(x, params, hidden_dim=hidden_dim, bidirectional=bidirectional)
        y = jax.block_until_ready(y)
        y_ref = _reference(x, params, hidden_dim=hidden_dim, bidirectional=bidirectional)
        assert y.shape == y_ref.shape, (y.shape, y_ref.shape)
        assert jnp.allclose(y, y_ref, atol=1e-4, rtol=1e-4), (
            f"mismatch (bidirectional={bidirectional}), "
            f"max abs err {jnp.max(jnp.abs(y - y_ref))}")

    print("KERNEL_OK")
</pallas_src>

<mosaic_0001>
module attributes {stable_mosaic.version = 11 : i64} {
  func.func @_gru_dir_kernel(%arg0: i32, %arg1: memref<1x2x16xf32, #tpu.memory_space<vmem>>, %arg2: memref<16x96xf32, #tpu.memory_space<vmem>>, %arg3: memref<32x96xf32, #tpu.memory_space<vmem>>, %arg4: memref<1x96xf32, #tpu.memory_space<vmem>>, %arg5: memref<1x96xf32, #tpu.memory_space<vmem>>, %arg6: memref<1x2x32xf32, #tpu.memory_space<vmem>>, %arg7: memref<2x32xf32, #tpu.memory_space<vmem>>) attributes {dimension_semantics = [#tpu.dimension_semantics<arbitrary>], iteration_bounds = array<i64: 8>, scalar_prefetch = 0 : i64, scratch_operands = 1 : i64, tpu.core_type = #tpu.core_type<tc>, window_params = [{transform_indices = @transform_0, window_bounds = array<i64: 1, 2, 16>}, {pipeline_mode = #tpu.pipeline_mode<synchronous>, transform_indices = @transform_1, window_bounds = array<i64: 16, 96>}, {pipeline_mode = #tpu.pipeline_mode<synchronous>, transform_indices = @transform_2, window_bounds = array<i64: 32, 96>}, {pipeline_mode = #tpu.pipeline_mode<synchronous>, transform_indices = @transform_3, window_bounds = array<i64: 1, 96>}, {pipeline_mode = #tpu.pipeline_mode<synchronous>, transform_indices = @transform_4, window_bounds = array<i64: 1, 96>}, {transform_indices = @transform_5, window_bounds = array<i64: 1, 2, 32>}]} {
    %c0_i32 = arith.constant 0 : i32
    %0 = arith.cmpi eq, %arg0, %c0_i32 : i32
    %1 = arith.extui %0 : i1 to i32
    %c0_i32_0 = arith.constant 0 : i32
    %2 = arith.cmpi ne, %1, %c0_i32_0 : i32
    scf.if %2 {
      %cst_26 = arith.constant 0.000000e+00 : f32
      %50 = vector.broadcast %cst_26 : f32 to vector<2x32xf32>
      %c0_27 = arith.constant 0 : index
      %c0_28 = arith.constant 0 : index
      %51 = vector.load %arg7[%c0_27, %c0_28] : memref<2x32xf32, #tpu.memory_space<vmem>>, vector<2x32xf32>
      tpu.vector_store %arg7[%c0_27, %c0_28], %50 {strides = array<i32>} : memref<2x32xf32, #tpu.memory_space<vmem>>, vector<2x32xf32>,
    } else {
    }
    %c0 = arith.constant 0 : index
    %c0_1 = arith.constant 0 : index
    %c0_2 = arith.constant 0 : index
    %3 = vector.load %arg1[%c0, %c0_1, %c0_2] : memref<1x2x16xf32, #tpu.memory_space<vmem>>, vector<1x2x16xf32>
    %4 = vector.shape_cast %3 : vector<1x2x16xf32> to vector<2x16xf32>
    %c0_3 = arith.constant 0 : index
    %c0_4 = arith.constant 0 : index
    %5 = vector.load %arg7[%c0_3, %c0_4] : memref<2x32xf32, #tpu.memory_space<vmem>>, vector<2x32xf32>
    %c0_5 = arith.constant 0 : index
    %c0_6 = arith.constant 0 : index
    %6 = vector.load %arg2[%c0_5, %c0_6] : memref<16x96xf32, #tpu.memory_space<vmem>>, vector<16x96xf32>
    %c0_7 = arith.constant 0 : index
    %c0_8 = arith.constant 0 : index
    %7 = vector.load %arg3[%c0_7, %c0_8] : memref<32x96xf32, #tpu.memory_space<vmem>>, vector<32x96xf32>
    %c0_9 = arith.constant 0 : index
    %c0_10 = arith.constant 0 : index
    %8 = vector.load %arg4[%c0_9, %c0_10] : memref<1x96xf32, #tpu.memory_space<vmem>>, vector<1x96xf32>
    %c0_11 = arith.constant 0 : index
    %c0_12 = arith.constant 0 : index
    %9 = vector.load %arg5[%c0_11, %c0_12] : memref<1x96xf32, #tpu.memory_space<vmem>>, vector<1x96xf32>
    %cst = arith.constant dense<0.000000e+00> : vector<2x96xf32>
    %10 = tpu.matmul %4, %6, %cst {dimension_numbers = #tpu.dot_dimension_numbers<[1], [0], [0], [1], [0, 0, 1, 1], [], []>} : vector<2x16xf32>, vector<16x96xf32>, vector<2x96xf32> -> vector<2x96xf32>
    %11 = vector.broadcast %8 : vector<1x96xf32> to vector<2x96xf32>
    %12 = arith.addf %10, %11 : vector<2x96xf32>
    %cst_13 = arith.constant dense<0.000000e+00> : vector<2x96xf32>
    %13 = tpu.matmul %5, %7, %cst_13 {dimension_numbers = #tpu.dot_dimension_numbers<[1], [0], [0], [1], [0, 0, 1, 1], [], []>} : vector<2x32xf32>, vector<32x96xf32>, vector<2x96xf32> -> vector<2x96xf32>
    %14 = vector.broadcast %9 : vector<1x96xf32> to vector<2x96xf32>
    %15 = arith.addf %13, %14 : vector<2x96xf32>
    %16 = vector.extract_strided_slice %12 {offsets = [0, 0], sizes = [2, 32], strides = [1, 1]} : vector<2x96xf32> to vector<2x32xf32>
    %17 = vector.extract_strided_slice %15 {offsets = [0, 0], sizes = [2, 32], strides = [1, 1]} : vector<2x96xf32> to vector<2x32xf32>
    %18 = arith.addf %16, %17 : vector<2x32xf32>
    %cst_14 = arith.constant 0.000000e+00 : f32
    %19 = vector.broadcast %cst_14 : f32 to vector<2x32xf32>
    %20 = arith.subf %19, %18 : vector<2x32xf32>
    %21 = math.exp %20 : vector<2x32xf32>
    %cst_15 = arith.constant 1.000000e+00 : f32
    %22 = vector.broadcast %cst_15 : f32 to vector<2x32xf32>
    %23 = arith.addf %22, %21 : vector<2x32xf32>
    %cst_16 = arith.constant 1.000000e+00 : f32
    %24 = vector.broadcast %cst_16 : f32 to vector<2x32xf32>
    %25 = arith.divf %24, %23 : vector<2x32xf32>
    %26 = vector.extract_strided_slice %12 {offsets = [0, 32], sizes = [2, 32], strides = [1, 1]} : vector<2x96xf32> to vector<2x32xf32>
    %27 = vector.extract_strided_slice %15 {offsets = [0, 32], sizes = [2, 32], strides = [1, 1]} : vector<2x96xf32> to vector<2x32xf32>
    %28 = arith.addf %26, %27 : vector<2x32xf32>
    %cst_17 = arith.constant 0.000000e+00 : f32
    %29 = vector.broadcast %cst_17 : f32 to vector<2x32xf32>
    %30 = arith.subf %29, %28 : vector<2x32xf32>
    %31 = math.exp %30 : vector<2x32xf32>
    %cst_18 = arith.constant 1.000000e+00 : f32
    %32 = vector.broadcast %cst_18 : f32 to vector<2x32xf32>
    %33 = arith.addf %32, %31 : vector<2x32xf32>
    %cst_19 = arith.constant 1.000000e+00 : f32
    %34 = vector.broadcast %cst_19 : f32 to vector<2x32xf32>
    %35 = arith.divf %34, %33 : vector<2x32xf32>
    %36 = vector.extract_strided_slice %12 {offsets = [0, 64], sizes = [2, 32], strides = [1, 1]} : vector<2x96xf32> to vector<2x32xf32>
    %37 = vector.extract_strided_slice %15 {offsets = [0, 64], sizes = [2, 32], strides = [1, 1]} : vector<2x96xf32> to vector<2x32xf32>
    %38 = arith.mulf %25, %37 : vector<2x32xf32>
    %39 = arith.addf %36, %38 : vector<2x32xf32>
    %40 = math.tanh %39 : vector<2x32xf32>
    %cst_20 = arith.constant 1.000000e+00 : f32
    %41 = vector.broadcast %cst_20 : f32 to vector<2x32xf32>
    %42 = arith.subf %41, %35 : vector<2x32xf32>
    %43 = arith.mulf %42, %40 : vector<2x32xf32>
    %44 = arith.mulf %35, %5 : vector<2x32xf32>
    %45 = arith.addf %43, %44 : vector<2x32xf32>
    %c0_21 = arith.constant 0 : index
    %c0_22 = arith.constant 0 : index
    %46 = vector.load %arg7[%c0_21, %c0_22] : memref<2x32xf32, #tpu.memory_space<vmem>>, vector<2x32xf32>
    tpu.vector_store %arg7[%c0_21, %c0_22], %45 {strides = array<i32>} : memref<2x32xf32, #tpu.memory_space<vmem>>, vector<2x32xf32>,
    %c0_23 = arith.constant 0 : index
    %c0_24 = arith.constant 0 : index
    %c0_25 = arith.constant 0 : index
    %47 = vector.load %arg6[%c0_23, %c0_24, %c0_25] : memref<1x2x32xf32, #tpu.memory_space<vmem>>, vector<1x2x32xf32>
    %48 = vector.shape_cast %47 : vector<1x2x32xf32> to vector<2x32xf32>
    %49 = vector.shape_cast %45 : vector<2x32xf32> to vector<1x2x32xf32>
    tpu.vector_store %arg6[%c0_23, %c0_24, %c0_25], %49 {strides = array<i32>} : memref<1x2x32xf32, #tpu.memory_space<vmem>>, vector<1x2x32xf32>,
    return
  }
  func.func @transform_0(%arg0: i32) -> (i32, i32, i32) {
    %c7_i32 = arith.constant 7 : i32
    %0 = arith.subi %c7_i32, %arg0 : i32
    %c0_i32 = arith.constant 0 : i32
    %c0_i32_0 = arith.constant 0 : i32
    %c0_i32_1 = arith.constant 0 : i32
    return %0, %c0_i32, %c0_i32_0 : i32, i32, i32
  }
  func.func @transform_1(%arg0: i32) -> (i32, i32) {
    %c0_i32 = arith.constant 0 : i32
    %c0_i32_0 = arith.constant 0 : i32
    %c0_i32_1 = arith.constant 0 : i32
    return %c0_i32, %c0_i32_0 : i32, i32
  }
  func.func @transform_2(%arg0: i32) -> (i32, i32) {
    %c0_i32 = arith.constant 0 : i32
    %c0_i32_0 = arith.constant 0 : i32
    %c0_i32_1 = arith.constant 0 : i32
    return %c0_i32, %c0_i32_0 : i32, i32
  }
  func.func @transform_3(%arg0: i32) -> (i32, i32) {
    %c0_i32 = arith.constant 0 : i32
    %c0_i32_0 = arith.constant 0 : i32
    %c0_i32_1 = arith.constant 0 : i32
    return %c0_i32, %c0_i32_0 : i32, i32
  }
  func.func @transform_4(%arg0: i32) -> (i32, i32) {
    %c0_i32 = arith.constant 0 : i32
    %c0_i32_0 = arith.constant 0 : i32
    %c0_i32_1 = arith.constant 0 : i32
    return %c0_i32, %c0_i32_0 : i32, i32
  }
  func.func @transform_5(%arg0: i32) -> (i32, i32, i32) {
    %c7_i32 = arith.constant 7 : i32
    %0 = arith.subi %c7_i32, %arg0 : i32
    %c0_i32 = arith.constant 0 : i32
    %c0_i32_0 = arith.constant 0 : i32
    %c0_i32_1 = arith.constant 0 : i32
    return %0, %c0_i32, %c0_i32_0 : i32, i32, i32
  }
}

</mosaic_0001>

<bundles_post_ra>
// kernel: tpu_custom_call.1
= control target key start
LH: loop header
LB: loop body
LE: loop exit
PB: predicated region body
PF: predicated region fallthrough
CT: control target
= control target key end

     0   :  { %10 = vsyncpa [#allocation4], 0  ;;  %s1099_s0 = inlined_call_operand.hbm [shape: f32[8,2,16], index: 0, kind: input, shape index: {}]   ;;  %s1100_s1 = inlined_call_operand.hbm [shape: f32[16,96], index: 1, kind: input, shape index: {}]   ;;  %s1101_s2 = inlined_call_operand.hbm [shape: f32[32,96], index: 2, kind: input, shape index: {}]   ;;  %s1102_s3 = inlined_call_operand.vmem [shape: f32[1,96], index: 3, kind: input, shape index: {}]   ;;  %s1103_s4 = inlined_call_operand.vmem [shape: f32[1,96], index: 4, kind: input, shape index: {}]   ;;  %s1104_s5 = inlined_call_operand.hbm [shape: f32[8,2,32], index: 5, kind: output, shape index: {}]  }
   0x1   :  { %12 = vsyncpa [#allocation4 + $0x1], 0 }
   0x2   :  { %13 = vsyncpa [#allocation7], 0 }
   0x3   :  { %14 = vsyncpa [#allocation5], 0 }
   0x4   :  { %16 = vsyncpa [#allocation5 + $0x1], 0  ;;  %s912_s18 = smov 0   ;;  %s914_s19 = smov 0  }
   0x5   :  { %s916_s20 = smov 0   ;;  %s918_s21 = smov 0  }
   0x6 LB: > { %s933_s22 = sadd.s32 4294967295, %s868_s21   ;;  %s592_s23 = sadd.s32 4294967294, %s868_s21   ;;  %s868_s21 = sphi %s918_s21, %s1126_s21   ;;  %s864_s20 = sphi %s916_s20, %s1125_s20   ;;  %s860_s19 = sphi %s914_s19, %s1124_s19   ;;  %s856_s18 = sphi %s912_s18, %s1123_s18  }
   0x7   : > { %p44_p0 = scmp.ne.s32.totalorder %s860_s19, %s856_s18  ;;  %p1105_p1 = scmp.eq.s32.totalorder %s933_s22, 0 }
   0x8   : > { %p160_p3 = scmp.eq.s32.totalorder %s592_s23, 7  ;;  %p593_p5 = scmp.ge.s32.totalorder %s868_s21, 1 }
   0x9   : > { %p942_p4 = por %p1105_p1, %p44_p0  ;;  %p167_p7 = scmp.lt.s32.totalorder %s868_s21, 9 }
   0xa   : > { %p947_p6 = por %p160_p3, %p44_p0  ;;  %s870_s27 = smov [#allocation6]  }
   0xb   : > { %s1109_s24 = scalar_select %p942_p4, 1, 0 }
   0xc   : > { %s1110_s25 = scalar_select %p947_p6, 1, 0 }
   0xd   : > { %p953_p9 = pnand %p593_p5, %p167_p7  ;;  %s179_s28 = sshll.u32 %s870_s27, 4  ;;  %s180_s28 = int_to_ptr.vmem [resolvable:$true] %s179_s28 }
   0xe   : > { %s871_s30 = smov [#allocation8]   ;;  %s731_s7 = scalar_lea.vmem %s180_s28, 256 }
   0xf   : > { %s1111_s26 = scalar_select %p953_p9, 1, 0 }
  0x10   : > { %p651_p10 = pneg %p953_p9  ;;  %s192_s6 = sshll.u32 %s871_s30, 4  ;;  %s193_s6 = int_to_ptr.vmem [resolvable:$true] %s192_s6 }
  0x11   : > { %p732_p13 = scmp.ne.s32.totalorder %s180_s28, %s731_s7  ;;  %p739_p5 = scmp.lt.s32.totalorder %s180_s28, %s180_s28 }
  0x12   : > { %p961_p11 = pnand %p651_p10, %p1105_p1  ;;  %p740_p7 = scmp.lt.s32.totalorder %s731_s7, %s731_s7 }
  0x14   : > { %p722_p12 = pneg %p961_p11  ;;  %p741_p8 = por %p740_p7, %p739_p5 }
  0x16   : > { %p734_p0 = pnand %p732_p13, %p722_p12 }
  0x18   : > { %p735_p3 = pneg %p734_p0 }
  0x1a   : > { %p742_p10 = pnand %p741_p8, %p735_p3 }
  0x1c   : > { %745 = shalt.err (!%p742_p10)
}
  0x1d   : > { %s872_s8 = smov 128   ;;  %s873_s9 = smov 8  }
  0x1e   : > { %654 = dma.hbm_to_vmem [thread:$0]  (!%p961_p11), %s1100_s1, 256, %s180_s28, [#allocation7], %s872_s8, %s872_s8, %s873_s9  }
  0x1f   : > { %s757_s12 = scalar_lea.vmem %s193_s6, 512  ;;  %p765_p2 = scmp.lt.s32.totalorder %s193_s6, %s193_s6 }
  0x20   : > { %p758_p1 = scmp.ne.s32.totalorder %s193_s6, %s757_s12  ;;  %p766_p6 = scmp.lt.s32.totalorder %s757_s12, %s757_s12 }
  0x22   : > { %p760_p13 = pnand %p758_p1, %p722_p12  ;;  %p767_p5 = por %p766_p6, %p765_p2 }
  0x24   : > { %p761_p0 = pneg %p760_p13 }
  0x26   : > { %p768_p8 = pnand %p767_p5, %p761_p0 }
  0x28   : > { %771 = shalt.err (!%p768_p8)
}
  0x29   : > { %657 = dma.hbm_to_vmem [thread:$0]  (!%p961_p11), %s1101_s2, 512, %s193_s6, [#allocation7], %s872_s8, %s872_s8, %s873_s9  }
  0x2a   : > { %s984_s15 = sadd.s32 1, %s868_s21   ;;  %s26_s16 = ssub.s32 7, %s868_s21 }
  0x2b   : > { %s27_s17 = ssub.s32 7, %s984_s15  ;;  %s31_s23 = sadd.s32 1, %s864_s20 }
  0x2c   : > { %s28_s27 = ssub.s32 %s26_s16, %s27_s17  ;;  %p38_p1 = scmp.ne.s32.totalorder %s864_s20, %s860_s19 }
  0x2d   : > { %p29_p2 = scmp.eq.s32.totalorder %s28_s27, 0  ;;  %p39_p6 = scmp.eq.s32.totalorder %s868_s21, 0 }
  0x2e   : > { %p1113_p12 = scmp.eq.s32.totalorder %s933_s22, 7  ;;  %p668_p7 = scmp.lt.s32.totalorder %s868_s21, 8 }
  0x2f   : > { %s1000_s29 = scalar_select %p29_p2, %s864_s20, %s31_s23  }
  0x30   : > { %p994_p3 = por %p1113_p12, %p38_p1  ;;  %p40_p10 = por %p39_p6, %p38_p1 }
  0x31   : > { %s212_s30 = sand.u32 1, %s864_s20   ;;  %s598_s7 = sshll.u32 %s26_s16, 5 }
  0x32   : > { %s1114_s28 = scalar_select %p994_p3, 1, 0 }
  0x33   : > { %s597_s6 = sshll.u32 %s212_s30, 1  ;;  %s1006_s10 = scalar_lea.hbm %s1099_s0, %s598_s7 }
  0x34   : > { %s216_s11 = scalar_lea.vmem [#allocation3], %s597_s6  ;;  %p1008_p11 = pnand %p668_p7, %p40_p10 }
  0x35   : > { %s224_s12 = sshll.u32 %s216_s11, 4  ;;  %s213_s14 = scalar_lea.sflag [#allocation4], %s212_s30  ;;  %s225_s12 = int_to_ptr.vmem [resolvable:$true] %s224_s12 }
  0x36   : > { %s772_s17 = scalar_lea.hbm %s1006_s10, 32  ;;  %p774_p0 = pneg %p1008_p11 }
  0x37   : > { %p773_p13 = scmp.ne.s32.totalorder %s1006_s10, %s772_s17  ;;  %s777_s27 = scalar_lea.hbm %s1099_s0, 256 }
  0x38   : > { %p778_p1 = scmp.lt.s32.totalorder %s1006_s10, %s1099_s0  ;;  %p779_p2 = scmp.lt.s32.totalorder %s777_s27, %s772_s17 }
  0x39   : > { %p775_p5 = pnand %p774_p0, %p773_p13 }
  0x3a   : > { %p780_p6 = por %p779_p2, %p778_p1 }
  0x3b   : > { %p776_p8 = pneg %p775_p5 }
  0x3d   : > { %p781_p12 = pnand %p780_p6, %p776_p8 }
  0x3f   : > { %784 = shalt.err (!%p781_p12)
}
  0x40   : > { %s785_s8 = scalar_lea.vmem %s225_s12, 32  ;;  %s874_s30 = smov [#allocation3]  }
  0x41   : > { %p786_p7 = scmp.ne.s32.totalorder %s225_s12, %s785_s8  ;;  %s790_s9 = sshll.u32 %s874_s30, 4  ;;  %s791_s9 = int_to_ptr.vmem [resolvable:$false] %s790_s9 }
  0x42   : > { %s792_s11 = scalar_lea.vmem %s791_s9, 64  ;;  %p793_p13 = scmp.lt.s32.totalorder %s225_s12, %s791_s9 }
  0x43   : > { %p788_p10 = pnand %p786_p7, %p774_p0  ;;  %p794_p5 = scmp.lt.s32.totalorder %s792_s11, %s785_s8 }
  0x45   : > { %p789_p3 = pneg %p788_p10  ;;  %p795_p4 = por %p794_p5, %p793_p13 }
  0x47   : > { %p796_p9 = pnand %p795_p4, %p789_p3 }
  0x49   : > { %799 = shalt.err (!%p796_p9)
}
  0x4a   : > { %661 = dma.hbm_to_vmem [thread:$0]  (!%p1008_p11), %s1006_s10, 32, %s225_s12, %s213_s14  }
  0x4b   : > { %p1116_p8 = scmp.ne.s32.totalorder %s1111_s26, 0 }
  0x4c   : > { %s1029_s17 = sand.u32 (!%p1116_p8), 1, %s860_s19   ;;  %p1117_p0 = scmp.ne.s32.totalorder (!%p1116_p8), %s1109_s24, 0 }
  0x4d   : > { %233 = sbr.rel (%p1116_p8) target bundleno = 798 (0x31e), region = 40  ;;  %s600_s16 = sshll.u32 (!%p1116_p8), %s1029_s17, 1 }
  0x4e   : > { %s236_s23 = scalar_lea.sflag (!%p1116_p8), [#allocation4], %s1029_s17  ;;  %s239_s27 = scalar_lea.vmem (!%p1116_p8), [#allocation3], %s600_s16 }
  0x52   : > { %843 = dma.done.wait (%p1117_p0), %s236_s23, 32  }
  0x53   : > { %845 = vsyncadd (%p1117_p0), %s236_s23, 4294967264  ;;  %p1118_p4 = scmp.eq.s32.totalorder %s933_s22, 0 }
  0x55   : > { %847 = dma.done.wait (%p1118_p4), [#allocation7], 768   ;;  %p1119_p9 = pmov %p1118_p4 }
  0x56   : > { %s1041_s26 = scalar_lea.vmem [#allocation9], %s600_s16  ;;  %p1120_p3 = scmp.ne.s32.totalorder %s933_s22, 0 }
  0x57   : > { %849 = vsyncadd (%p1119_p9), [#allocation7], 4294966528 }
  0x58   : > { %279 = sbr.rel (%p1120_p3) target bundleno = 95 (0x5f), region = 56 }
  0x5d   : > { %vm280_vm0 = vcmask 254976   ;;  %v875_v0 = vmov 0.0  }
  0x5e   : > { %281 = vst.msk [vmem:[#allocation2] sm:$0x3] %vm280_vm0, %v875_v0 }
  0x5f PF: > { %v289_v1 = vld [vmem:[#allocation8 + $0x18] sm:$0xff]  ;;  %v876_v3 = vmov 0.0   ;;  %v288_v4 = vld [vmem:[#allocation8 + $0x10] sm:$0xff]  ;;  %v287_v6 = vld [vmem:[#allocation8 + $0x8] sm:$0xff]  ;;  %vm298_vm1 = vcmask 130048   ;;  %vm877_vm2 = vmmov 0  }
  0x60   : > { %v285_v2 = vld [vmem:[#allocation6 + $0x8] sm:$0xff]  ;;  %628 = vmatprep.subr.mxu1 %v876_v3  ;;  %621 = vmatprep.subr.mxu0 %v876_v3  ;;  %v284_v5 = vld [vmem:[#allocation6] sm:$0xff]  ;;  %v282_v7 = vld [vmem:[%s239_s27] sm:$0x3]  ;;  %vm378_vm3 = vcmask 261120   ;;  %s878_s12 = smov 64  }
  0x61   : > { %629 = vmatpush3.msra.mxu1 %v289_v1  ;;  %622 = vmatpush3.msra.mxu0 %v285_v2  ;;  %v286_v8 = vld [vmem:[#allocation8] sm:$0xff]  ;;  %v607_v11 = vld [vmem:[%s1103_s4] ss:$0 sm:$0xff]  ;;  %s879_s7 = smov 96   ;;  %s880_s6 = smov 32   ;;  %vm485_vm4 = vcmask 254976  }
  0x62   : > { %630 = vmatprep.subr.mxu1 %v876_v3  ;;  %623 = vmatprep.subr.mxu0 %v876_v3  ;;  %v605_v16 = vld [vmem:[%s1102_s3] ss:$0 sm:$0xff]  ;;  %s496_s8 = ssub.s32 7, %s933_s22  ;;  %s503_s9 = sshll.u32 %s1041_s26, 4  ;;  %s1058_s9 = int_to_ptr.vmem [resolvable:$true] %s503_s9 }
  0x63   : > { %631 = vmatpush3.msra.mxu1 %v288_v4  ;;  %624 = vmatpush3.msra.mxu0 %v284_v5  ;;  %s610_s30 = sshll.u32 %s496_s8, 5  ;;  %s489_s27 = scalar_lea.sflag [#allocation5], %s1029_s17 }
  0x64   : > { %632 = vmatprep.subr.mxu1 %v876_v3  ;;  %625 = vmatprep.mubr.msk.f32.mxu0 %vm877_vm2, %v876_v3  ;;  %s1056_s23 = scalar_lea.hbm %s1104_s5, %s610_s30  ;;  %s800_s24 = scalar_lea.vmem %s1058_s9, 32 }
  0x65   : > { %633 = vmatpush3.msra.mxu1 %v287_v6  ;;  %636 = vmatprep.mubr.msk.f32.mxu1 %vm877_vm2, %v876_v3  ;;  %v283_v9 = vld [vmem:[#allocation2] sm:$0x3]  ;;  %p801_p11 = scmp.ne.s32.totalorder %s1058_s9, %s800_s24  ;;  %p1121_p1 = scmp.ne.s32.totalorder %s1114_s28, 0 }
  0x66   : > { %634 = vmatprep.subr.mxu1 %v876_v3  ;;  %626 = vmatmul.mubr.msk.f32.vlgmr.msra.gmra.mxu0 %vm298_vm1, %v282_v7  ;;  %s881_s22 = smov [#allocation9]  }
  0x67   : > { %635 = vmatpush3.msra.mxu1 %v286_v8  ;;  %p802_p2 = pnand %p801_p11, %p1121_p1  ;;  %s804_s10 = sshll.u32 %s881_s22, 4  ;;  %s805_s10 = int_to_ptr.vmem [resolvable:$false] %s804_s10 }
  0x68   : > { %637 = vmatmul.mubr.msk.f32.vlgmr.msra.gmra.mxu1 %vm378_vm3, %v283_v9  ;;  %p807_p12 = scmp.lt.s32.totalorder %s1058_s9, %s805_s10 }
  0x69   : > { %p803_p6 = pneg %p802_p2 }
 0x126   : > { %v368_v10 = vpop.f32.mrf.mxu0 }
 0x127   : > { %v369_v17 = vadd.f32 %v605_v16, %v368_v10 }
 0x128   : > { %v448_v12 = vpop.f32.mrf.mxu1  ;;  %v627_v13 = vpop.f32.mrf.mxu0 }
 0x129   : > { %v449_v14 = vadd.f32 %v607_v11, %v448_v12 }
 0x12a   : > { %v638_v15 = vpop.f32.mrf.mxu1 }
 0x12b   : > { %460 = vrot.lane.b32.xlu0 %v449_v14, %s878_s12  ;;  %v452_v18 = vadd.f32 %v449_v14, %v369_v17 }
 0x12d   : > { %v453_v19 = vsub.f32 0.0, %v452_v18 }
 0x12f   : > { %v454_v20 = vmul.f32 1.442695, %v453_v19 }
 0x131   : > { %714 = vpow2.f32 %v454_v20 }
 0x13e   : > { %v715_v21 = vpop.eup %714 }
 0x13f   : > { %v456_v22 = vadd.f32 1.0, %v715_v21 }
 0x141   : > { %716 = vrcp.f32 %v456_v22 }
 0x14e   : > { %v717_v23 = vpop.eup %716 }
 0x14f   : > { %v470_v30 = vsub.f32 1.0, %v717_v23 }
 0x19d   : > { %v461_v24 = vpop.permute.xlu0 %460 }
 0x19e   : > { %v463_v25 = vmul.f32 %v717_v23, %v461_v24 }
 0x1a0   : > { %465 = vrot.lane.b32.xlu0 %v463_v25, %s878_s12  ;;  %s806_s12 = scalar_lea.vmem %s805_s10, 64 }
 0x1a1   : > { %p808_p7 = scmp.lt.s32.totalorder %s806_s12, %s800_s24 }
 0x1a3   : > { %p809_p10 = por %p808_p7, %p807_p12 }
 0x1a5   : > { %p810_p13 = pnand %p809_p10, %p803_p6 }
 0x212   : > { %v466_v26 = vpop.permute.xlu0 %465 }
 0x213   : > { %v468_v27 = vadd.f32 %v466_v26, %v369_v17 }
 0x215   : > { %718 = vtanh.f32 %v468_v27 }
 0x222   : > { %v719_v28 = vpop.eup %718 }
 0x223   : > { %472 = vrot.lane.b32.xlu1 %v719_v28, %s879_s7 }
 0x227   : > { %476 = vrot.lane.b32.xlu1 %v283_v9, %s880_s6 }
 0x295   : > { %v473_v29 = vpop.permute.xlu1 %472 }
 0x296   : > { %v475_v32 = vmul.f32 %v473_v29, %v470_v30 }
 0x299   : > { %v477_v31 = vpop.permute.xlu1 %476 }
 0x29a   : > { %v479_v33 = vmul.f32 %v717_v23, %v477_v31 }
 0x29c   : > { %v480_v34 = vadd.f32 %v479_v33, %v475_v32 }
 0x29e   : > { %482 = vrot.lane.b32.xlu0 %v480_v34, %s879_s7 }
 0x310   : > { %v483_v35 = vpop.permute.xlu0 %482 }
 0x311   : > { %486 = vst.msk [vmem:[#allocation2] sm:$0x3] %vm485_vm4, %v483_v35  ;;  %487 = vst.msk [vmem:[%s1041_s26] sm:$0x3] %vm485_vm4, %v483_v35 }
 0x312   : > { %813 = shalt.err (!%p810_p13)
}
 0x313   : > { %s814_s26 = scalar_lea.hbm %s1056_s23, 32  ;;  %s818_s14 = scalar_lea.hbm %s1104_s5, 256 }
 0x314   : > { %p815_p5 = scmp.ne.s32.totalorder %s1056_s23, %s814_s26  ;;  %p819_p4 = scmp.lt.s32.totalorder %s1056_s23, %s1104_s5 }
 0x315   : > { %p820_p9 = scmp.lt.s32.totalorder %s818_s14, %s814_s26 }
 0x316   : > { %p816_p8 = pnand %p815_p5, %p1121_p1 }
 0x317   : > { %p821_p3 = por %p820_p9, %p819_p4 }
 0x318   : > { %p817_p0 = pneg %p816_p8 }
 0x31a   : > { %p822_p11 = pnand %p821_p3, %p817_p0 }
 0x31c   : > { %825 = shalt.err (!%p822_p11)
}
 0x31d   : > { %649 = dma.vmem_to_hbm [thread:$0]  (%p1121_p1), %s1058_s9, 32, %s1056_s23, %s489_s27  }
 0x31e PF: > { %p671_p2 = scmp.ge.s32.totalorder %s868_s21, 2  ;;  %s515_s8 = sand.u32 1, %s856_s18  }
 0x31f   : > { %p1122_p6 = scmp.ne.s32.totalorder %s1110_s25, 0  ;;  %s516_s30 = scalar_lea.sflag [#allocation5], %s515_s8 }
 0x321   : > { %p663_p12 = pnand %p671_p2, %p1122_p6 }
 0x323   : > { %p664_p7 = pneg %p663_p12 }
 0x325   : > { %851 = dma.done.wait (%p664_p7), %s516_s30, 32  }
 0x326   : > { %853 = vsyncadd (%p664_p7), %s516_s30, 4294967264  ;;  %p19_p10 = scmp.ge.s32.totalorder %s984_s15, 10   ;;  %s1123_s18 = smov %s860_s19 }
 0x327   : > { %s1124_s19 = smov %s864_s20  ;;  %s1125_s20 = smov %s1000_s29 }
 0x328   : > { %s1126_s21 = smov %s984_s15  ;;  %21 = sbr.rel (!%p19_p10) target bundleno = 6 (0x6), region = 97 }
 0x32d   :  { %521 = vsyncpa [#allocation4], 1 }
 0x32e   :  { %523 = vsyncpa [#allocation4 + $0x1], 1 }
 0x32f   :  { %524 = vsyncpa [#allocation7], 1 }
 0x330   :  { %525 = vsyncpa [#allocation5], 1 }
 0x331   :  { %527 = vsyncpa [#allocation5 + $0x1], 1 }

</bundles_post_ra>
